<compile_context>
chip_gen: v6e
topology: v6e:2x2x1
jax: 0.10.0
libtpu: 0.0.40
codegen_flags: <defaults>
</compile_context>

<pallas_src>
import jax
import jax.numpy as jnp
from jax.experimental import pallas as pl
from jax.experimental.pallas import tpu as pltpu


def lstm_spam_kernel(idx_ref, emb_ref, w_ih_ref, w_hh_ref, b_ref, w_fc_ref,
                     b_fc_ref, out_ref, xg_scr):
    """Fully fused forward: embedding gather + input projection + LSTM + FC + sigmoid.

    idx_ref:  (T*B, 1) int32 time-major token ids (rows [t*B,(t+1)*B) = step t), VMEM
    emb_ref:  (V_pad, E)  embedding table (vocab padded to 128 lanes), VMEM
    w_ih_ref: (E, 4H)     input->gates weights, transposed; g-gate cols pre-scaled x2
    w_hh_ref: (H, 4H)     hidden->gates weights, transposed; g-gate cols pre-scaled x2
    b_ref:    (1, 4H)     combined bias (b_ih + b_hh); g-gate slice pre-scaled x2
    w_fc_ref: (1, H)      final linear weight, VMEM
    b_fc_ref: (1, 1)      final linear bias, SMEM scalar
    out_ref:  (B, 1)      sigmoid probabilities
    xg_scr:   (T*B, 4H)   scratch: precomputed input projections for all steps
    """
    TB = idx_ref.shape[0]
    V = emb_ref.shape[0]
    B = out_ref.shape[0]
    H = w_hh_ref.shape[0]
    T = TB // B

    # --- Phase 1: fused embedding gather + input projection for ALL timesteps.
    # One-hot row gather as an MXU matmul (exact: one 1.0 per row, rest zeros),
    # then x @ W_ih^T with the bias folded in once (hoisted off the serial path).
    lane_ids = jax.lax.broadcasted_iota(jnp.int32, (TB, V), 1)
    onehot = (idx_ref[...] == lane_ids).astype(jnp.float32)          # (TB, V)
    x = jnp.dot(onehot, emb_ref[...],
                preferred_element_type=jnp.float32)                   # (TB, E)
    xg_scr[...] = (
        jnp.dot(x, w_ih_ref[...], preferred_element_type=jnp.float32)
        + b_ref[...])                                                  # (TB, 4H)

    # Hoist the recurrent weight load out of the loop.
    w_hh = w_hh_ref[...]  # (H, 4H)

    def step(t, carry):
        h, c = carry
        off = pl.multiple_of(t * B, B)                  # sublane-aligned row offset
        xg_t = xg_scr[pl.ds(off, B), :]                 # (B, 4H)
        gates = xg_t + jnp.dot(h, w_hh, preferred_element_type=jnp.float32)
        # 4H == 128 lanes: ONE full-vreg sigmoid.  The g-gate lanes arrive
        # pre-scaled by 2 (folded into W_ih/W_hh/b in the wrapper), so
        # tanh(g) = 2*sigmoid(2g) - 1 is a cheap VPU fixup — no full-width tanh.
        s = jax.nn.sigmoid(gates)
        i_g = s[:, 0 * H:1 * H]
        f_g = s[:, 1 * H:2 * H]
        g_g = 2.0 * s[:, 2 * H:3 * H] - 1.0
        o_g = s[:, 3 * H:4 * H]
        c_new = f_g * c + i_g * g_g
        h_new = o_g * jnp.tanh(c_new)
        return h_new, c_new

    h0 = jnp.zeros((B, H), jnp.float32)
    c0 = jnp.zeros((B, H), jnp.float32)
    h_T, _ = jax.lax.fori_loop(0, T, step, (h0, c0), unroll=True)

    # Dropout is identity in eval mode.  FC(H -> 1) as VPU multiply + lane
    # reduction (avoids an N=1 MXU push); bias is an SMEM scalar; then sigmoid.
    logits = jnp.sum(h_T * w_fc_ref[...], axis=1, keepdims=True) + b_fc_ref[0, 0]
    out_ref[...] = jax.nn.sigmoid(logits)


def spam_detection_forward(tokens, params):
    """tokens: (B, T) int32 token ids.  Returns (B, 1) f32 probabilities."""
    emb = params["embedding"]          # (V, E)
    w_ih = params["w_ih"]              # (4H, E)
    w_hh = params["w_hh"]              # (4H, H)
    b_ih = params["b_ih"]              # (4H,)
    b_hh = params["b_hh"]              # (4H,)
    w_fc = params["w_fc"]              # (1, H)
    b_fc = params["b_fc"]              # (1,)

    B, T = tokens.shape
    V, E = emb.shape
    H = w_hh.shape[1]

    # Pad batch to the sublane width (8) so every (B, .) tile fills full vreg
    # rows; pad vocab to the lane width (128) so the one-hot gather matmul's
    # contraction dim is lane-aligned.
    B_pad = -(-B // 8) * 8
    V_pad = -(-V // 128) * 128

    # Time-major int32 indices (cheap int transpose; the gather itself is fused
    # into the kernel).  Column layout (TB, 1) broadcasts against a lane iota.
    tok_pad = jnp.zeros((B_pad, T), jnp.int32).at[:B, :].set(tokens.astype(jnp.int32))
    idx_tm = jnp.transpose(tok_pad, (1, 0)).reshape(T * B_pad, 1)

    emb_pad = jnp.zeros((V_pad, E), jnp.float32).at[:V, :].set(emb.astype(jnp.float32))

    # Weight prep (one-time, outside the serial path):
    #  * transpose so in-kernel dots are plain (M,K)@(K,N);
    #  * pre-scale the g-gate columns (PyTorch gate order i,f,g,o -> block 2)
    #    by 2 so the kernel needs only ONE sigmoid per step
    #    (tanh(x) = 2*sigmoid(2x) - 1).
    gate_scale = jnp.concatenate(
        [jnp.ones((2 * H,), jnp.float32),
         2.0 * jnp.ones((H,), jnp.float32),
         jnp.ones((H,), jnp.float32)])                                # (4H,)
    w_ih_t = (jnp.transpose(w_ih).astype(jnp.float32) * gate_scale[None, :])  # (E, 4H)
    w_hh_t = (jnp.transpose(w_hh).astype(jnp.float32) * gate_scale[None, :])  # (H, 4H)
    b_all = ((b_ih + b_hh).astype(jnp.float32) * gate_scale).reshape(1, 4 * H)
    w_fc_row = w_fc.reshape(1, H).astype(jnp.float32)                 # (1, H)
    b_fc_2d = b_fc.reshape(1, 1).astype(jnp.float32)                  # (1, 1) -> SMEM

    vmem = pl.BlockSpec(memory_space=pltpu.MemorySpace.VMEM)
    smem = pl.BlockSpec(memory_space=pltpu.MemorySpace.SMEM)

    out_pad = pl.pallas_call(
        lstm_spam_kernel,
        out_shape=jax.ShapeDtypeStruct((B_pad, 1), jnp.float32),
        in_specs=[vmem, vmem, vmem, vmem, vmem, vmem, smem],
        out_specs=vmem,
        scratch_shapes=[pltpu.VMEM((T * B_pad, 4 * H), jnp.float32)],
    )(idx_tm, emb_pad, w_ih_t, w_hh_t, b_all, w_fc_row, b_fc_2d)

    return out_pad[:B]


def make_params(key, vocab_size, embed_dim, hidden_dim):
    ks = jax.random.split(key, 7)
    scale = 0.1
    return {
        "embedding": scale * jax.random.normal(ks[0], (vocab_size, embed_dim), jnp.float32),
        "w_ih": scale * jax.random.normal(ks[1], (4 * hidden_dim, embed_dim), jnp.float32),
        "w_hh": scale * jax.random.normal(ks[2], (4 * hidden_dim, hidden_dim), jnp.float32),
        "b_ih": scale * jax.random.normal(ks[3], (4 * hidden_dim,), jnp.float32),
        "b_hh": scale * jax.random.normal(ks[4], (4 * hidden_dim,), jnp.float32),
        "w_fc": scale * jax.random.normal(ks[5], (1, hidden_dim), jnp.float32),
        "b_fc": scale * jax.random.normal(ks[6], (1,), jnp.float32),
    }


def reference_forward(tokens, params):
    """Pure-JAX reference (mirrors torch semantics, dropout in eval mode)."""
    emb = jnp.take(params["embedding"], tokens, axis=0)        # (B, T, E)
    B, T, E = emb.shape
    H = params["w_hh"].shape[1]
    h = jnp.zeros((B, H), jnp.float32)
    c = jnp.zeros((B, H), jnp.float32)
    w_ih_t = params["w_ih"].T
    w_hh_t = params["w_hh"].T
    b = params["b_ih"] + params["b_hh"]
    for t in range(T):
        gates = emb[:, t, :] @ w_ih_t + h @ w_hh_t + b
        i_g = jax.nn.sigmoid(gates[:, 0 * H:1 * H])
        f_g = jax.nn.sigmoid(gates[:, 1 * H:2 * H])
        g_g = jnp.tanh(gates[:, 2 * H:3 * H])
        o_g = jax.nn.sigmoid(gates[:, 3 * H:4 * H])
        c = f_g * c + i_g * g_g
        h = o_g * jnp.tanh(c)
    logits = h @ params["w_fc"].T + params["b_fc"]
    return jax.nn.sigmoid(logits)


if __name__ == "__main__":
    VOCAB, EMBED, HIDDEN = 50, 32, 32
    BATCH, SEQ = 2, 8

    key = jax.random.PRNGKey(0)
    k_param, k_tok = jax.random.split(key)
    params = make_params(k_param, VOCAB, EMBED, HIDDEN)
    tokens = jax.random.randint(k_tok, (BATCH, SEQ), 0, VOCAB, dtype=jnp.int32)

    out = spam_detection_forward(tokens, params)
    out = jax.block_until_ready(out)

    ref = reference_forward(tokens, params)
    assert out.shape == (BATCH, 1)
    # Tolerance relaxed slightly vs. 1e-5: the kernel computes tanh(g) as
    # 2*sigmoid(2g)-1 (mathematically identical, numerically ~1e-7 different)
    # and uses explicit f32 MXU accumulation.
    assert jnp.allclose(out, ref, atol=1e-4, rtol=1e-4), (out, ref)

    print("KERNEL_OK")
</pallas_src>

<mosaic_0001>
module attributes {stable_mosaic.version = 11 : i64} {
  func.func @lstm_spam_kernel(%arg0: memref<64x1xi32, #tpu.memory_space<vmem>>, %arg1: memref<128x32xf32, #tpu.memory_space<vmem>>, %arg2: memref<32x128xf32, #tpu.memory_space<vmem>>, %arg3: memref<32x128xf32, #tpu.memory_space<vmem>>, %arg4: memref<1x128xf32, #tpu.memory_space<vmem>>, %arg5: memref<1x32xf32, #tpu.memory_space<vmem>>, %arg6: memref<1x1xf32, #tpu.memory_space<smem>>, %arg7: memref<8x1xf32, #tpu.memory_space<vmem>>, %arg8: memref<64x128xf32, #tpu.memory_space<vmem>>) attributes {dimension_semantics = [], scalar_prefetch = 0 : i64, scratch_operands = 1 : i64, tpu.core_type = #tpu.core_type<tc>} {
    %0 = tpu.iota {dimensions = array<i32: 1>} : vector<64x128xi32>
    %c0 = arith.constant 0 : index
    %c0_0 = arith.constant 0 : index
    %1 = vector.load %arg0[%c0, %c0_0] : memref<64x1xi32, #tpu.memory_space<vmem>>, vector<64x1xi32>
    %2 = vector.broadcast %1 : vector<64x1xi32> to vector<64x128xi32>
    %3 = arith.cmpi eq, %2, %0 : vector<64x128xi32>
    %4 = arith.extui %3 : vector<64x128xi1> to vector<64x128xi32>
    %5 = arith.sitofp %4 : vector<64x128xi32> to vector<64x128xf32>
    %c0_1 = arith.constant 0 : index
    %c0_2 = arith.constant 0 : index
    %6 = vector.load %arg1[%c0_1, %c0_2] : memref<128x32xf32, #tpu.memory_space<vmem>>, vector<128x32xf32>
    %cst = arith.constant dense<0.000000e+00> : vector<64x32xf32>
    %7 = tpu.matmul %5, %6, %cst {dimension_numbers = #tpu.dot_dimension_numbers<[1], [0], [0], [1], [0, 0, 1, 1], [], []>} : vector<64x128xf32>, vector<128x32xf32>, vector<64x32xf32> -> vector<64x32xf32>
    %c0_3 = arith.constant 0 : index
    %c0_4 = arith.constant 0 : index
    %8 = vector.load %arg2[%c0_3, %c0_4] : memref<32x128xf32, #tpu.memory_space<vmem>>, vector<32x128xf32>
    %cst_5 = arith.constant dense<0.000000e+00> : vector<64x128xf32>
    %9 = tpu.matmul %7, %8, %cst_5 {dimension_numbers = #tpu.dot_dimension_numbers<[1], [0], [0], [1], [0, 0, 1, 1], [], []>} : vector<64x32xf32>, vector<32x128xf32>, vector<64x128xf32> -> vector<64x128xf32>
    %c0_6 = arith.constant 0 : index
    %c0_7 = arith.constant 0 : index
    %10 = vector.load %arg4[%c0_6, %c0_7] : memref<1x128xf32, #tpu.memory_space<vmem>>, vector<1x128xf32>
    %11 = vector.broadcast %10 : vector<1x128xf32> to vector<64x128xf32>
    %12 = arith.addf %9, %11 : vector<64x128xf32>
    %c0_8 = arith.constant 0 : index
    %c0_9 = arith.constant 0 : index
    %13 = vector.load %arg8[%c0_8, %c0_9] : memref<64x128xf32, #tpu.memory_space<vmem>>, vector<64x128xf32>
    tpu.vector_store %arg8[%c0_8, %c0_9], %12 {strides = array<i32>} : memref<64x128xf32, #tpu.memory_space<vmem>>, vector<64x128xf32>,
    %c0_10 = arith.constant 0 : index
    %c0_11 = arith.constant 0 : index
    %14 = vector.load %arg3[%c0_10, %c0_11] : memref<32x128xf32, #tpu.memory_space<vmem>>, vector<32x128xf32>
    %cst_12 = arith.constant 0.000000e+00 : f32
    %15 = vector.broadcast %cst_12 : f32 to vector<8x32xf32>
    %cst_13 = arith.constant 0.000000e+00 : f32
    %16 = vector.broadcast %cst_13 : f32 to vector<8x32xf32>
    %c0_i32 = arith.constant 0 : i32
    %c8_i32 = arith.constant 8 : i32
    %17 = arith.muli %c0_i32, %c8_i32 : i32
    %18 = tpu.assume_multiple %17, 8 : i32
    %19 = arith.index_cast %18 : i32 to index
    %c0_14 = arith.constant 0 : index
    %20 = vector.load %arg8[%19, %c0_14] : memref<64x128xf32, #tpu.memory_space<vmem>>, vector<8x128xf32>
    %cst_15 = arith.constant dense<0.000000e+00> : vector<8x128xf32>
    %21 = tpu.matmul %15, %14, %cst_15 {dimension_numbers = #tpu.dot_dimension_numbers<[1], [0], [0], [1], [0, 0, 1, 1], [], []>} : vector<8x32xf32>, vector<32x128xf32>, vector<8x128xf32> -> vector<8x128xf32>
    %22 = arith.addf %20, %21 : vector<8x128xf32>
    %23 = arith.negf %22 : vector<8x128xf32>
    %24 = math.exp %23 : vector<8x128xf32>
    %cst_16 = arith.constant 1.000000e+00 : f32
    %25 = vector.broadcast %cst_16 : f32 to vector<8x128xf32>
    %26 = arith.addf %25, %24 : vector<8x128xf32>
    %27 = arith.divf %25, %26 : vector<8x128xf32>
    %28 = vector.extract_strided_slice %27 {offsets = [0, 0], sizes = [8, 32], strides = [1, 1]} : vector<8x128xf32> to vector<8x32xf32>
    %29 = vector.extract_strided_slice %27 {offsets = [0, 32], sizes = [8, 32], strides = [1, 1]} : vector<8x128xf32> to vector<8x32xf32>
    %30 = vector.extract_strided_slice %27 {offsets = [0, 64], sizes = [8, 32], strides = [1, 1]} : vector<8x128xf32> to vector<8x32xf32>
    %cst_17 = arith.constant 2.000000e+00 : f32
    %31 = vector.broadcast %cst_17 : f32 to vector<8x32xf32>
    %32 = arith.mulf %31, %30 : vector<8x32xf32>
    %cst_18 = arith.constant 1.000000e+00 : f32
    %33 = vector.broadcast %cst_18 : f32 to vector<8x32xf32>
    %34 = arith.subf %32, %33 : vector<8x32xf32>
    %35 = vector.extract_strided_slice %27 {offsets = [0, 96], sizes = [8, 32], strides = [1, 1]} : vector<8x128xf32> to vector<8x32xf32>
    %36 = arith.mulf %29, %16 : vector<8x32xf32>
    %37 = arith.mulf %28, %34 : vector<8x32xf32>
    %38 = arith.addf %36, %37 : vector<8x32xf32>
    %39 = math.tanh %38 : vector<8x32xf32>
    %40 = arith.mulf %35, %39 : vector<8x32xf32>
    %c1_i32 = arith.constant 1 : i32
    %c8_i32_19 = arith.constant 8 : i32
    %41 = arith.muli %c1_i32, %c8_i32_19 : i32
    %42 = tpu.assume_multiple %41, 8 : i32
    %43 = arith.index_cast %42 : i32 to index
    %c0_20 = arith.constant 0 : index
    %44 = vector.load %arg8[%43, %c0_20] : memref<64x128xf32, #tpu.memory_space<vmem>>, vector<8x128xf32>
    %cst_21 = arith.constant dense<0.000000e+00> : vector<8x128xf32>
    %45 = tpu.matmul %40, %14, %cst_21 {dimension_numbers = #tpu.dot_dimension_numbers<[1], [0], [0], [1], [0, 0, 1, 1], [], []>} : vector<8x32xf32>, vector<32x128xf32>, vector<8x128xf32> -> vector<8x128xf32>
    %46 = arith.addf %44, %45 : vector<8x128xf32>
    %47 = arith.negf %46 : vector<8x128xf32>
    %48 = math.exp %47 : vector<8x128xf32>
    %cst_22 = arith.constant 1.000000e+00 : f32
    %49 = vector.broadcast %cst_22 : f32 to vector<8x128xf32>
    %50 = arith.addf %49, %48 : vector<8x128xf32>
    %51 = arith.divf %49, %50 : vector<8x128xf32>
    %52 = vector.extract_strided_slice %51 {offsets = [0, 0], sizes = [8, 32], strides = [1, 1]} : vector<8x128xf32> to vector<8x32xf32>
    %53 = vector.extract_strided_slice %51 {offsets = [0, 32], sizes = [8, 32], strides = [1, 1]} : vector<8x128xf32> to vector<8x32xf32>
    %54 = vector.extract_strided_slice %51 {offsets = [0, 64], sizes = [8, 32], strides = [1, 1]} : vector<8x128xf32> to vector<8x32xf32>
    %cst_23 = arith.constant 2.000000e+00 : f32
    %55 = vector.broadcast %cst_23 : f32 to vector<8x32xf32>
    %56 = arith.mulf %55, %54 : vector<8x32xf32>
    %cst_24 = arith.constant 1.000000e+00 : f32
    %57 = vector.broadcast %cst_24 : f32 to vector<8x32xf32>
    %58 = arith.subf %56, %57 : vector<8x32xf32>
    %59 = vector.extract_strided_slice %51 {offsets = [0, 96], sizes = [8, 32], strides = [1, 1]} : vector<8x128xf32> to vector<8x32xf32>
    %60 = arith.mulf %53, %38 : vector<8x32xf32>
    %61 = arith.mulf %52, %58 : vector<8x32xf32>
    %62 = arith.addf %60, %61 : vector<8x32xf32>
    %63 = math.tanh %62 : vector<8x32xf32>
    %64 = arith.mulf %59, %63 : vector<8x32xf32>
    %c2_i32 = arith.constant 2 : i32
    %c8_i32_25 = arith.constant 8 : i32
    %65 = arith.muli %c2_i32, %c8_i32_25 : i32
    %66 = tpu.assume_multiple %65, 8 : i32
    %67 = arith.index_cast %66 : i32 to index
    %c0_26 = arith.constant 0 : index
    %68 = vector.load %arg8[%67, %c0_26] : memref<64x128xf32, #tpu.memory_space<vmem>>, vector<8x128xf32>
    %cst_27 = arith.constant dense<0.000000e+00> : vector<8x128xf32>
    %69 = tpu.matmul %64, %14, %cst_27 {dimension_numbers = #tpu.dot_dimension_numbers<[1], [0], [0], [1], [0, 0, 1, 1], [], []>} : vector<8x32xf32>, vector<32x128xf32>, vector<8x128xf32> -> vector<8x128xf32>
    %70 = arith.addf %68, %69 : vector<8x128xf32>
    %71 = arith.negf %70 : vector<8x128xf32>
    %72 = math.exp %71 : vector<8x128xf32>
    %cst_28 = arith.constant 1.000000e+00 : f32
    %73 = vector.broadcast %cst_28 : f32 to vector<8x128xf32>
    %74 = arith.addf %73, %72 : vector<8x128xf32>
    %75 = arith.divf %73, %74 : vector<8x128xf32>
    %76 = vector.extract_strided_slice %75 {offsets = [0, 0], sizes = [8, 32], strides = [1, 1]} : vector<8x128xf32> to vector<8x32xf32>
    %77 = vector.extract_strided_slice %75 {offsets = [0, 32], sizes = [8, 32], strides = [1, 1]} : vector<8x128xf32> to vector<8x32xf32>
    %78 = vector.extract_strided_slice %75 {offsets = [0, 64], sizes = [8, 32], strides = [1, 1]} : vector<8x128xf32> to vector<8x32xf32>
    %cst_29 = arith.constant 2.000000e+00 : f32
    %79 = vector.broadcast %cst_29 : f32 to vector<8x32xf32>
    %80 = arith.mulf %79, %78 : vector<8x32xf32>
    %cst_30 = arith.constant 1.000000e+00 : f32
    %81 = vector.broadcast %cst_30 : f32 to vector<8x32xf32>
    %82 = arith.subf %80, %81 : vector<8x32xf32>
    %83 = vector.extract_strided_slice %75 {offsets = [0, 96], sizes = [8, 32], strides = [1, 1]} : vector<8x128xf32> to vector<8x32xf32>
    %84 = arith.mulf %77, %62 : vector<8x32xf32>
    %85 = arith.mulf %76, %82 : vector<8x32xf32>
    %86 = arith.addf %84, %85 : vector<8x32xf32>
    %87 = math.tanh %86 : vector<8x32xf32>
    %88 = arith.mulf %83, %87 : vector<8x32xf32>
    %c3_i32 = arith.constant 3 : i32
    %c8_i32_31 = arith.constant 8 : i32
    %89 = arith.muli %c3_i32, %c8_i32_31 : i32
    %90 = tpu.assume_multiple %89, 8 : i32
    %91 = arith.index_cast %90 : i32 to index
    %c0_32 = arith.constant 0 : index
    %92 = vector.load %arg8[%91, %c0_32] : memref<64x128xf32, #tpu.memory_space<vmem>>, vector<8x128xf32>
    %cst_33 = arith.constant dense<0.000000e+00> : vector<8x128xf32>
    %93 = tpu.matmul %88, %14, %cst_33 {dimension_numbers = #tpu.dot_dimension_numbers<[1], [0], [0], [1], [0, 0, 1, 1], [], []>} : vector<8x32xf32>, vector<32x128xf32>, vector<8x128xf32> -> vector<8x128xf32>
    %94 = arith.addf %92, %93 : vector<8x128xf32>
    %95 = arith.negf %94 : vector<8x128xf32>
    %96 = math.exp %95 : vector<8x128xf32>
    %cst_34 = arith.constant 1.000000e+00 : f32
    %97 = vector.broadcast %cst_34 : f32 to vector<8x128xf32>
    %98 = arith.addf %97, %96 : vector<8x128xf32>
    %99 = arith.divf %97, %98 : vector<8x128xf32>
    %100 = vector.extract_strided_slice %99 {offsets = [0, 0], sizes = [8, 32], strides = [1, 1]} : vector<8x128xf32> to vector<8x32xf32>
    %101 = vector.extract_strided_slice %99 {offsets = [0, 32], sizes = [8, 32], strides = [1, 1]} : vector<8x128xf32> to vector<8x32xf32>
    %102 = vector.extract_strided_slice %99 {offsets = [0, 64], sizes = [8, 32], strides = [1, 1]} : vector<8x128xf32> to vector<8x32xf32>
    %cst_35 = arith.constant 2.000000e+00 : f32
    %103 = vector.broadcast %cst_35 : f32 to vector<8x32xf32>
    %104 = arith.mulf %103, %102 : vector<8x32xf32>
    %cst_36 = arith.constant 1.000000e+00 : f32
    %105 = vector.broadcast %cst_36 : f32 to vector<8x32xf32>
    %106 = arith.subf %104, %105 : vector<8x32xf32>
    %107 = vector.extract_strided_slice %99 {offsets = [0, 96], sizes = [8, 32], strides = [1, 1]} : vector<8x128xf32> to vector<8x32xf32>
    %108 = arith.mulf %101, %86 : vector<8x32xf32>
    %109 = arith.mulf %100, %106 : vector<8x32xf32>
    %110 = arith.addf %108, %109 : vector<8x32xf32>
    %111 = math.tanh %110 : vector<8x32xf32>
    %112 = arith.mulf %107, %111 : vector<8x32xf32>
    %c4_i32 = arith.constant 4 : i32
    %c8_i32_37 = arith.constant 8 : i32
    %113 = arith.muli %c4_i32, %c8_i32_37 : i32
    %114 = tpu.assume_multiple %113, 8 : i32
    %115 = arith.index_cast %114 : i32 to index
    %c0_38 = arith.constant 0 : index
    %116 = vector.load %arg8[%115, %c0_38] : memref<64x128xf32, #tpu.memory_space<vmem>>, vector<8x128xf32>
    %cst_39 = arith.constant dense<0.000000e+00> : vector<8x128xf32>
    %117 = tpu.matmul %112, %14, %cst_39 {dimension_numbers = #tpu.dot_dimension_numbers<[1], [0], [0], [1], [0, 0, 1, 1], [], []>} : vector<8x32xf32>, vector<32x128xf32>, vector<8x128xf32> -> vector<8x128xf32>
    %118 = arith.addf %116, %117 : vector<8x128xf32>
    %119 = arith.negf %118 : vector<8x128xf32>
    %120 = math.exp %119 : vector<8x128xf32>
    %cst_40 = arith.constant 1.000000e+00 : f32
    %121 = vector.broadcast %cst_40 : f32 to vector<8x128xf32>
    %122 = arith.addf %121, %120 : vector<8x128xf32>
    %123 = arith.divf %121, %122 : vector<8x128xf32>
    %124 = vector.extract_strided_slice %123 {offsets = [0, 0], sizes = [8, 32], strides = [1, 1]} : vector<8x128xf32> to vector<8x32xf32>
    %125 = vector.extract_strided_slice %123 {offsets = [0, 32], sizes = [8, 32], strides = [1, 1]} : vector<8x128xf32> to vector<8x32xf32>
    %126 = vector.extract_strided_slice %123 {offsets = [0, 64], sizes = [8, 32], strides = [1, 1]} : vector<8x128xf32> to vector<8x32xf32>
    %cst_41 = arith.constant 2.000000e+00 : f32
    %127 = vector.broadcast %cst_41 : f32 to vector<8x32xf32>
    %128 = arith.mulf %127, %126 : vector<8x32xf32>
    %cst_42 = arith.constant 1.000000e+00 : f32
    %129 = vector.broadcast %cst_42 : f32 to vector<8x32xf32>
    %130 = arith.subf %128, %129 : vector<8x32xf32>
    %131 = vector.extract_strided_slice %123 {offsets = [0, 96], sizes = [8, 32], strides = [1, 1]} : vector<8x128xf32> to vector<8x32xf32>
    %132 = arith.mulf %125, %110 : vector<8x32xf32>
    %133 = arith.mulf %124, %130 : vector<8x32xf32>
    %134 = arith.addf %132, %133 : vector<8x32xf32>
    %135 = math.tanh %134 : vector<8x32xf32>
    %136 = arith.mulf %131, %135 : vector<8x32xf32>
    %c5_i32 = arith.constant 5 : i32
    %c8_i32_43 = arith.constant 8 : i32
    %137 = arith.muli %c5_i32, %c8_i32_43 : i32
    %138 = tpu.assume_multiple %137, 8 : i32
    %139 = arith.index_cast %138 : i32 to index
    %c0_44 = arith.constant 0 : index
    %140 = vector.load %arg8[%139, %c0_44] : memref<64x128xf32, #tpu.memory_space<vmem>>, vector<8x128xf32>
    %cst_45 = arith.constant dense<0.000000e+00> : vector<8x128xf32>
    %141 = tpu.matmul %136, %14, %cst_45 {dimension_numbers = #tpu.dot_dimension_numbers<[1], [0], [0], [1], [0, 0, 1, 1], [], []>} : vector<8x32xf32>, vector<32x128xf32>, vector<8x128xf32> -> vector<8x128xf32>
    %142 = arith.addf %140, %141 : vector<8x128xf32>
    %143 = arith.negf %142 : vector<8x128xf32>
    %144 = math.exp %143 : vector<8x128xf32>
    %cst_46 = arith.constant 1.000000e+00 : f32
    %145 = vector.broadcast %cst_46 : f32 to vector<8x128xf32>
    %146 = arith.addf %145, %144 : vector<8x128xf32>
    %147 = arith.divf %145, %146 : vector<8x128xf32>
    %148 = vector.extract_strided_slice %147 {offsets = [0, 0], sizes = [8, 32], strides = [1, 1]} : vector<8x128xf32> to vector<8x32xf32>
    %149 = vector.extract_strided_slice %147 {offsets = [0, 32], sizes = [8, 32], strides = [1, 1]} : vector<8x128xf32> to vector<8x32xf32>
    %150 = vector.extract_strided_slice %147 {offsets = [0, 64], sizes = [8, 32], strides = [1, 1]} : vector<8x128xf32> to vector<8x32xf32>
    %cst_47 = arith.constant 2.000000e+00 : f32
    %151 = vector.broadcast %cst_47 : f32 to vector<8x32xf32>
    %152 = arith.mulf %151, %150 : vector<8x32xf32>
    %cst_48 = arith.constant 1.000000e+00 : f32
    %153 = vector.broadcast %cst_48 : f32 to vector<8x32xf32>
    %154 = arith.subf %152, %153 : vector<8x32xf32>
    %155 = vector.extract_strided_slice %147 {offsets = [0, 96], sizes = [8, 32], strides = [1, 1]} : vector<8x128xf32> to vector<8x32xf32>
    %156 = arith.mulf %149, %134 : vector<8x32xf32>
    %157 = arith.mulf %148, %154 : vector<8x32xf32>
    %158 = arith.addf %156, %157 : vector<8x32xf32>
    %159 = math.tanh %158 : vector<8x32xf32>
    %160 = arith.mulf %155, %159 : vector<8x32xf32>
    %c6_i32 = arith.constant 6 : i32
    %c8_i32_49 = arith.constant 8 : i32
    %161 = arith.muli %c6_i32, %c8_i32_49 : i32
    %162 = tpu.assume_multiple %161, 8 : i32
    %163 = arith.index_cast %162 : i32 to index
    %c0_50 = arith.constant 0 : index
    %164 = vector.load %arg8[%163, %c0_50] : memref<64x128xf32, #tpu.memory_space<vmem>>, vector<8x128xf32>
    %cst_51 = arith.constant dense<0.000000e+00> : vector<8x128xf32>
    %165 = tpu.matmul %160, %14, %cst_51 {dimension_numbers = #tpu.dot_dimension_numbers<[1], [0], [0], [1], [0, 0, 1, 1], [], []>} : vector<8x32xf32>, vector<32x128xf32>, vector<8x128xf32> -> vector<8x128xf32>
    %166 = arith.addf %164, %165 : vector<8x128xf32>
    %167 = arith.negf %166 : vector<8x128xf32>
    %168 = math.exp %167 : vector<8x128xf32>
    %cst_52 = arith.constant 1.000000e+00 : f32
    %169 = vector.broadcast %cst_52 : f32 to vector<8x128xf32>
    %170 = arith.addf %169, %168 : vector<8x128xf32>
    %171 = arith.divf %169, %170 : vector<8x128xf32>
    %172 = vector.extract_strided_slice %171 {offsets = [0, 0], sizes = [8, 32], strides = [1, 1]} : vector<8x128xf32> to vector<8x32xf32>
    %173 = vector.extract_strided_slice %171 {offsets = [0, 32], sizes = [8, 32], strides = [1, 1]} : vector<8x128xf32> to vector<8x32xf32>
    %174 = vector.extract_strided_slice %171 {offsets = [0, 64], sizes = [8, 32], strides = [1, 1]} : vector<8x128xf32> to vector<8x32xf32>
    %cst_53 = arith.constant 2.000000e+00 : f32
    %175 = vector.broadcast %cst_53 : f32 to vector<8x32xf32>
    %176 = arith.mulf %175, %174 : vector<8x32xf32>
    %cst_54 = arith.constant 1.000000e+00 : f32
    %177 = vector.broadcast %cst_54 : f32 to vector<8x32xf32>
    %178 = arith.subf %176, %177 : vector<8x32xf32>
    %179 = vector.extract_strided_slice %171 {offsets = [0, 96], sizes = [8, 32], strides = [1, 1]} : vector<8x128xf32> to vector<8x32xf32>
    %180 = arith.mulf %173, %158 : vector<8x32xf32>
    %181 = arith.mulf %172, %178 : vector<8x32xf32>
    %182 = arith.addf %180, %181 : vector<8x32xf32>
    %183 = math.tanh %182 : vector<8x32xf32>
    %184 = arith.mulf %179, %183 : vector<8x32xf32>
    %c7_i32 = arith.constant 7 : i32
    %c8_i32_55 = arith.constant 8 : i32
    %185 = arith.muli %c7_i32, %c8_i32_55 : i32
    %186 = tpu.assume_multiple %185, 8 : i32
    %187 = arith.index_cast %186 : i32 to index
    %c0_56 = arith.constant 0 : index
    %188 = vector.load %arg8[%187, %c0_56] : memref<64x128xf32, #tpu.memory_space<vmem>>, vector<8x128xf32>
    %cst_57 = arith.constant dense<0.000000e+00> : vector<8x128xf32>
    %189 = tpu.matmul %184, %14, %cst_57 {dimension_numbers = #tpu.dot_dimension_numbers<[1], [0], [0], [1], [0, 0, 1, 1], [], []>} : vector<8x32xf32>, vector<32x128xf32>, vector<8x128xf32> -> vector<8x128xf32>
    %190 = arith.addf %188, %189 : vector<8x128xf32>
    %191 = arith.negf %190 : vector<8x128xf32>
    %192 = math.exp %191 : vector<8x128xf32>
    %cst_58 = arith.constant 1.000000e+00 : f32
    %193 = vector.broadcast %cst_58 : f32 to vector<8x128xf32>
    %194 = arith.addf %193, %192 : vector<8x128xf32>
    %195 = arith.divf %193, %194 : vector<8x128xf32>
    %196 = vector.extract_strided_slice %195 {offsets = [0, 0], sizes = [8, 32], strides = [1, 1]} : vector<8x128xf32> to vector<8x32xf32>
    %197 = vector.extract_strided_slice %195 {offsets = [0, 32], sizes = [8, 32], strides = [1, 1]} : vector<8x128xf32> to vector<8x32xf32>
    %198 = vector.extract_strided_slice %195 {offsets = [0, 64], sizes = [8, 32], strides = [1, 1]} : vector<8x128xf32> to vector<8x32xf32>
    %cst_59 = arith.constant 2.000000e+00 : f32
    %199 = vector.broadcast %cst_59 : f32 to vector<8x32xf32>
    %200 = arith.mulf %199, %198 : vector<8x32xf32>
    %cst_60 = arith.constant 1.000000e+00 : f32
    %201 = vector.broadcast %cst_60 : f32 to vector<8x32xf32>
    %202 = arith.subf %200, %201 : vector<8x32xf32>
    %203 = vector.extract_strided_slice %195 {offsets = [0, 96], sizes = [8, 32], strides = [1, 1]} : vector<8x128xf32> to vector<8x32xf32>
    %204 = arith.mulf %197, %182 : vector<8x32xf32>
    %205 = arith.mulf %196, %202 : vector<8x32xf32>
    %206 = arith.addf %204, %205 : vector<8x32xf32>
    %207 = math.tanh %206 : vector<8x32xf32>
    %208 = arith.mulf %203, %207 : vector<8x32xf32>
    %c8_i32_61 = arith.constant 8 : i32
    %c0_62 = arith.constant 0 : index
    %c0_63 = arith.constant 0 : index
    %209 = vector.load %arg5[%c0_62, %c0_63] : memref<1x32xf32, #tpu.memory_space<vmem>>, vector<1x32xf32>
    %210 = vector.broadcast %209 : vector<1x32xf32> to vector<8x32xf32>
    %211 = arith.mulf %208, %210 : vector<8x32xf32>
    %cst_64 = arith.constant dense<0.000000e+00> : vector<8xf32>
    %212 = vector.multi_reduction <add>, %211, %cst_64 [1] : vector<8x32xf32> to vector<8xf32>
    %213 = vector.shape_cast %212 : vector<8xf32> to vector<8x1xf32>
    %c0_65 = arith.constant 0 : index
    %c0_66 = arith.constant 0 : index
    %214 = memref.load %arg6[%c0_65, %c0_66] : memref<1x1xf32, #tpu.memory_space<smem>>
    %215 = vector.broadcast %214 : f32 to vector<8x1xf32>
    %216 = arith.addf %213, %215 : vector<8x1xf32>
    %217 = arith.negf %216 : vector<8x1xf32>
    %218 = math.exp %217 : vector<8x1xf32>
    %cst_67 = arith.constant 1.000000e+00 : f32
    %219 = vector.broadcast %cst_67 : f32 to vector<8x1xf32>
    %220 = arith.addf %219, %218 : vector<8x1xf32>
    %221 = arith.divf %219, %220 : vector<8x1xf32>
    %c0_68 = arith.constant 0 : index
    %c0_69 = arith.constant 0 : index
    %222 = vector.load %arg7[%c0_68, %c0_69] : memref<8x1xf32, #tpu.memory_space<vmem>>, vector<8x1xf32>
    tpu.vector_store %arg7[%c0_68, %c0_69], %221 {strides = array<i32>} : memref<8x1xf32, #tpu.memory_space<vmem>>, vector<8x1xf32>,
    return
  }
}

</mosaic_0001>

<bundles_post_ra>
// kernel: tpu_custom_call.1
= control target key start
LH: loop header
LB: loop body
LE: loop exit
PB: predicated region body
PF: predicated region fallthrough
CT: control target
= control target key end

     0   :  { %v1551_v0 = vmov 0   ;;  %v27_v28 = vlaneseq  ;;  %v1552_v32 = vmov 1.0   ;;  %v1553_v40 = vmov 0.0   ;;  %s1556_s16 = smov 32   ;;  %s1557_s19 = smov 96   ;;  %s1861_s0 = inlined_call_operand.vmem [shape: s32[64,1], index: 0, kind: input, shape index: {}]   ;;  %s1862_s1 = inlined_call_operand.vmem [shape: f32[128,32], index: 1, kind: input, shape index: {}]   ;;  %s1863_s2 = inlined_call_operand.vmem [shape: f32[32,128], index: 2, kind: input, shape index: {}]   ;;  %s1864_s3 = inlined_call_operand.vmem [shape: f32[32,128], index: 3, kind: input, shape index: {}]   ;;  %s1865_s4 = inlined_call_operand.vmem [shape: f32[1,128], index: 4, kind: input, shape index: {}]   ;;  %s1866_s5 = inlined_call_operand.vmem [shape: f32[1,32], index: 5, kind: input, shape index: {}]   ;;  %s1867_s6 = inlined_call_operand.<no memory space> [shape: f32[1,1], index: 6, kind: input, shape index: {}]   ;;  %s1868_s7 = inlined_call_operand.vmem [shape: f32[8,1], index: 7, kind: output, shape index: {}]  }
   0x1   :  { %1498 = vset.pattern.permute.xlu1 %v1551_v0  ;;  %1497 = vset.pattern.permute.xlu0 %v1551_v0  ;;  %v31_v1 = vld [vmem:[%s1861_s0 + $0x10] sm:$0xff]  ;;  %v29_v2 = vld [vmem:[%s1861_s0] sm:$0xff]  ;;  %v32_v3 = vld [vmem:[%s1861_s0 + $0x18] sm:$0xff]  ;;  %vm1554_vm8 = vmmov 0   ;;  %vm217_vm9 = vcmask 261120   ;;  %vm1206_vm10 = vcmask 7168  }
   0x2   :  { %44 = vperm.xlu1 %1498, %v31_v1   ;;  %38 = vperm.xlu0 %1497, %v29_v2   ;;  %v30_v4 = vld [vmem:[%s1861_s0 + $0x8] sm:$0xff]  ;;  %v100_v5 = vld [vmem:[%s1862_s1 + $0x78] sm:$0xff]  ;;  %v99_v6 = vld [vmem:[%s1862_s1 + $0x70] sm:$0xff]  ;;  %v28_v29 = vand.u32 127, %v27_v28 }
   0x3   :  { %1338 = vmatprep.subr.mxu0 %v100_v5  ;;  %v98_v7 = vld [vmem:[%s1862_s1 + $0x68] sm:$0xff]  ;;  %v33_v9 = vld [vmem:[%s1861_s0 + $0x20] sm:$0xff]  ;;  %v36_v11 = vld [vmem:[%s1861_s0 + $0x38] sm:$0xff] }
   0x4   :  { %1339 = vmatpush3.msra.mxu0 %v100_v5  ;;  %v34_v8 = vld [vmem:[%s1861_s0 + $0x28] sm:$0xff]  ;;  %v97_v10 = vld [vmem:[%s1862_s1 + $0x60] sm:$0xff]  ;;  %v35_v12 = vld [vmem:[%s1861_s0 + $0x30] sm:$0xff] }
   0x5   :  { %1340 = vmatprep.subr.mxu0 %v99_v6  ;;  %v96_v13 = vld [vmem:[%s1862_s1 + $0x58] sm:$0xff]  ;;  %v95_v14 = vld [vmem:[%s1862_s1 + $0x50] sm:$0xff]  ;;  %v94_v15 = vld [vmem:[%s1862_s1 + $0x48] sm:$0xff] }
   0x6   :  { %47 = vperm.xlu1 %1498, %v32_v3   ;;  %41 = vperm.xlu0 %1497, %v30_v4   ;;  %v209_v16 = vld [vmem:[%s1863_s2 + $0x18] sm:$0xff]  ;;  %v208_v17 = vld [vmem:[%s1863_s2 + $0x10] sm:$0xff]  ;;  %v93_v18 = vld [vmem:[%s1862_s1 + $0x40] sm:$0xff] }
   0x7   :  { %1341 = vmatpush3.msra.mxu0 %v99_v6  ;;  %1382 = vmatprep.subr.mxu1 %v209_v16  ;;  %v207_v19 = vld [vmem:[%s1863_s2 + $0x8] sm:$0xff]  ;;  %v92_v20 = vld [vmem:[%s1862_s1 + $0x38] sm:$0xff]  ;;  %v91_v21 = vld [vmem:[%s1862_s1 + $0x30] sm:$0xff] }
   0x8   :  { %1342 = vmatprep.subr.mxu0 %v98_v7  ;;  %1383 = vmatpush3.msra.mxu1 %v209_v16  ;;  %v90_v22 = vld [vmem:[%s1862_s1 + $0x28] sm:$0xff]  ;;  %v89_v23 = vld [vmem:[%s1862_s1 + $0x20] sm:$0xff]  ;;  %v88_v24 = vld [vmem:[%s1862_s1 + $0x18] sm:$0xff] }
   0x9   :  { %1343 = vmatpush3.msra.mxu0 %v98_v7  ;;  %1384 = vmatprep.subr.mxu1 %v208_v17  ;;  %v87_v25 = vld [vmem:[%s1862_s1 + $0x10] sm:$0xff]  ;;  %v86_v26 = vld [vmem:[%s1862_s1 + $0x8] sm:$0xff]  ;;  %v85_v27 = vld [vmem:[%s1862_s1] sm:$0xff] }
   0xa   :  { %53 = vperm.xlu1 %1498, %v34_v8   ;;  %50 = vperm.xlu0 %1497, %v33_v9   ;;  %v206_v39 = vld [vmem:[%s1863_s2] sm:$0xff]  ;;  %v1687_v41 = vld [vmem:[%s1864_s3 + $0x18] sm:$0xff]  ;;  %v1694_v42 = vld [vmem:[%s1864_s3 + $0x10] sm:$0xff] }
   0xb   :  { %1344 = vmatprep.subr.mxu0 %v97_v10  ;;  %1385 = vmatpush3.msra.mxu1 %v208_v17  ;;  %v1701_v43 = vld [vmem:[%s1864_s3 + $0x8] sm:$0xff]  ;;  %v1708_v44 = vld [vmem:[%s1864_s3] sm:$0xff] }
   0xc   :  { %1345 = vmatpush3.msra.mxu0 %v97_v10  ;;  %1386 = vmatprep.subr.mxu1 %v207_v19  ;;  %v1228_v53 = vld [vmem:[%s1865_s4] ss:$0 sm:$0xff]  ;;  %s1555_s4 = smov 64  }
   0xd   :  { %1346 = vmatprep.subr.mxu0 %v96_v13  ;;  %1387 = vmatpush3.msra.mxu1 %v207_v19 }
   0xe   :  { %59 = vperm.xlu1 %1498, %v36_v11   ;;  %56 = vperm.xlu0 %1497, %v35_v12  }
   0xf   :  { %1347 = vmatpush3.msra.mxu0 %v96_v13  ;;  %1388 = vmatprep.subr.mxu1 %v206_v39 }
  0x10   :  { %1348 = vmatprep.subr.mxu0 %v95_v14  ;;  %1389 = vmatpush3.msra.mxu1 %v206_v39 }
  0x11   :  { %1349 = vmatpush3.msra.mxu0 %v95_v14  ;;  %1402 = vmatprep.subr.mxu1 %v1553_v40 }
  0x12   :  { %1350 = vmatprep.subr.mxu0 %v94_v15 }
  0x13   :  { %1351 = vmatpush3.msra.mxu0 %v94_v15 }
  0x14   :  { %1352 = vmatprep.subr.mxu0 %v93_v18 }
  0x15   :  { %1353 = vmatpush3.msra.mxu0 %v93_v18 }
  0x16   :  { %1354 = vmatprep.subr.mxu0 %v92_v20 }
  0x17   :  { %1355 = vmatpush3.msra.mxu0 %v92_v20 }
  0x18   :  { %1356 = vmatprep.subr.mxu0 %v91_v21 }
  0x19   :  { %1357 = vmatpush3.msra.mxu0 %v91_v21 }
  0x1a   :  { %1358 = vmatprep.subr.mxu0 %v90_v22 }
  0x1b   :  { %1359 = vmatpush3.msra.mxu0 %v90_v22 }
  0x1c   :  { %1360 = vmatprep.subr.mxu0 %v89_v23 }
  0x1d   :  { %1361 = vmatpush3.msra.mxu0 %v89_v23 }
  0x1e   :  { %1362 = vmatprep.subr.mxu0 %v88_v24 }
  0x1f   :  { %1363 = vmatpush3.msra.mxu0 %v88_v24 }
  0x20   :  { %1364 = vmatprep.subr.mxu0 %v87_v25 }
  0x21   :  { %1365 = vmatpush3.msra.mxu0 %v87_v25 }
  0x22   :  { %1366 = vmatprep.subr.mxu0 %v86_v26 }
  0x23   :  { %1367 = vmatpush3.msra.mxu0 %v86_v26 }
  0x24   :  { %1368 = vmatprep.subr.mxu0 %v85_v27 }
  0x25   :  { %1369 = vmatpush3.msra.mxu0 %v85_v27 }
  0x26   :  { %1435 = vmatprep.subr.mxu0 %v1553_v40 }
  0x7d   :  { %v45_v30 = vpop.permute.xlu1 %44  ;;  %v39_v31 = vpop.permute.xlu0 %38 }
  0x7e   :  { %vm61_vm0 = vcmp.eq.s32.totalorder %v39_v31, %v28_v29  ;;  %vm63_vm1 = vcmp.eq.s32.totalorder %v45_v30, %v28_v29 }
  0x7f   :  { %1370 = vmatprep.mubr.msk.f32.mxu0 %vm61_vm0, %v1552_v32 }
  0x81   :  { %v48_v33 = vpop.permute.xlu1 %47  ;;  %v42_v34 = vpop.permute.xlu0 %41 }
  0x82   :  { %vm62_vm2 = vcmp.eq.s32.totalorder %v42_v34, %v28_v29  ;;  %vm64_vm3 = vcmp.eq.s32.totalorder %v48_v33, %v28_v29 }
  0x83   :  { %1371 = vmatmul.mubr.msk.f32.vlgmr.msra.gmra.mxu0 %vm62_vm2, %v1552_v32 }
  0x84   :  { %1373 = vmatprep.mubr.msk.f32.mxu0 %vm63_vm1, %v1552_v32  ;;  %1436 = vmatpush3.msra.mxu0 %v1687_v41 }
  0x85   :  { %v54_v35 = vpop.permute.xlu1 %53  ;;  %v51_v36 = vpop.permute.xlu0 %50  ;;  %1437 = vmatprep.subr.mxu0 %v1553_v40 }
  0x86   :  { %vm65_vm4 = vcmp.eq.s32.totalorder %v51_v36, %v28_v29  ;;  %vm66_vm5 = vcmp.eq.s32.totalorder %v54_v35, %v28_v29  ;;  %1438 = vmatpush3.msra.mxu0 %v1694_v42 }
  0x87   :  { %1374 = vmatmul.mubr.msk.f32.gmra.mxu0 %vm64_vm3, %v1552_v32  ;;  %1439 = vmatprep.subr.mxu0 %v1553_v40 }
  0x88   :  { %1376 = vmatprep.mubr.msk.f32.mxu0 %vm65_vm4, %v1552_v32  ;;  %1440 = vmatpush3.msra.mxu0 %v1701_v43 }
  0x89   :  { %v57_v37 = vpop.permute.xlu0 %56  ;;  %v60_v38 = vpop.permute.xlu1 %59  ;;  %1441 = vmatprep.subr.mxu0 %v1553_v40 }
  0x8a   :  { %vm67_vm6 = vcmp.eq.s32.totalorder %v57_v37, %v28_v29  ;;  %vm68_vm7 = vcmp.eq.s32.totalorder %v60_v38, %v28_v29  ;;  %1442 = vmatpush3.msra.mxu0 %v1708_v44 }
  0x8b   :  { %1377 = vmatmul.mubr.msk.f32.gmra.mxu0 %vm66_vm5, %v1552_v32  ;;  %1457 = vmatprep.subr.mxu0 %v1553_v40 }
  0x8c   :  { %1379 = vmatprep.mubr.msk.f32.mxu0 %vm67_vm6, %v1552_v32 }
  0x8f   :  { %1380 = vmatmul.mubr.msk.f32.gmra.mxu0 %vm68_vm7, %v1552_v32 }
  0x90   :  { %1443 = vmatprep.mubr.msk.f32.mxu0 %vm1554_vm8, %v1553_v40 }
 0x143   :  { %v1372_v45 = vpop.f32.mrf.mxu0 }
 0x145   :  { %v167_v46 = vpop.f32.mrf.mxu0 }
 0x146   :  { %1390 = vmatprep.mubr.msk.f32.mxu1 %vm217_vm9, %v167_v46 }
 0x147   :  { %v1375_v47 = vpop.f32.mrf.mxu0  ;;  %1391 = vmatmul.mubr.msk.f32.vlgmr.msra.gmra.mxu1 %vm217_vm9, %v1372_v45 }
 0x148   :  { %1403 = vmatpush3.msra.mxu1 %v1687_v41 }
 0x149   :  { %v177_v48 = vpop.f32.mrf.mxu0  ;;  %1404 = vmatprep.subr.mxu1 %v1553_v40 }
 0x14a   :  { %1393 = vmatprep.mubr.msk.f32.mxu1 %vm217_vm9, %v177_v48  ;;  %1405 = vmatpush3.msra.mxu1 %v1694_v42 }
 0x14b   :  { %v1378_v49 = vpop.f32.mrf.mxu0  ;;  %1394 = vmatmul.mubr.msk.f32.gmra.mxu1 %vm217_vm9, %v1375_v47  ;;  %1406 = vmatprep.subr.mxu1 %v1553_v40 }
 0x14c   :  { %1407 = vmatpush3.msra.mxu1 %v1701_v43 }
 0x14d   :  { %v187_v50 = vpop.f32.mrf.mxu0  ;;  %1408 = vmatprep.subr.mxu1 %v1553_v40 }
 0x14e   :  { %1396 = vmatprep.mubr.msk.f32.mxu1 %vm217_vm9, %v187_v50  ;;  %1409 = vmatpush3.msra.mxu1 %v1708_v44 }
 0x14f   :  { %v1381_v51 = vpop.f32.mrf.mxu0  ;;  %1397 = vmatmul.mubr.msk.f32.gmra.mxu1 %vm217_vm9, %v1378_v49  ;;  %1413 = vmatprep.subr.mxu1 %v1553_v40 }
 0x151   :  { %v197_v52 = vpop.f32.mrf.mxu0 }
 0x152   :  { %1399 = vmatprep.mubr.msk.f32.mxu1 %vm217_vm9, %v197_v52 }
 0x153   :  { %1400 = vmatmul.mubr.msk.f32.gmra.mxu1 %vm217_vm9, %v1381_v51 }
 0x154   :  { %1410 = vmatprep.mubr.msk.f32.mxu1 %vm1554_vm8, %v1553_v40 }
 0x157   :  { %1411 = vmatmul.mubr.f32.vlgmr.msra.gmra.mxu1 %v1553_v40 }
 0x158   :  { %1414 = vmatpush3.msra.mxu1 %v1687_v41  ;;  %1421 = vmatprep.mubr.msk.f32.mxu1 %vm1554_vm8, %v1553_v40 }
 0x159   :  { %1415 = vmatprep.subr.mxu1 %v1553_v40 }
 0x15a   :  { %1416 = vmatpush3.msra.mxu1 %v1694_v42 }
 0x15b   :  { %1417 = vmatprep.subr.mxu1 %v1553_v40 }
 0x15c   :  { %1418 = vmatpush3.msra.mxu1 %v1701_v43 }
 0x15d   :  { %1419 = vmatprep.subr.mxu1 %v1553_v40 }
 0x15e   :  { %1420 = vmatpush3.msra.mxu1 %v1708_v44 }
 0x15f   :  { %1424 = vmatprep.subr.mxu1 %v1553_v40 }
 0x207   :  { %v1392_v54 = vpop.f32.mrf.mxu1 }
 0x208   :  { %v314_v55 = vadd.f32 %v1392_v54, %v1228_v53 }
 0x209   :  { %v308_v56 = vpop.f32.mrf.mxu1 }
 0x20a   :  { %v309_v4 = vadd.f32 %v1228_v53, %v308_v56 }
 0x20b   :  { %v1395_v57 = vpop.f32.mrf.mxu1 }
 0x20c   :  { %v1746_v58 = vadd.f32 %v1395_v57, %v1228_v53 }
 0x20d   :  { %v318_v59 = vpop.f32.mrf.mxu1 }
 0x20e   :  { %v1748_v60 = vadd.f32 %v1228_v53, %v318_v59 }
 0x20f   :  { %v1398_v61 = vpop.f32.mrf.mxu1 }
 0x210   :  { %v1750_v62 = vadd.f32 %v1398_v61, %v1228_v53 }
 0x211   :  { %v328_v63 = vpop.f32.mrf.mxu1 }
 0x212   :  { %v1752_v0 = vadd.f32 %v1228_v53, %v328_v63 }
 0x213   :  { %v1401_v1 = vpop.f32.mrf.mxu1 }
 0x214   :  { %v1754_v2 = vadd.f32 %v1401_v1, %v1228_v53 }
 0x215   :  { %v338_v3 = vpop.f32.mrf.mxu1 }
 0x216   :  { %v1756_v5 = vadd.f32 %v1228_v53, %v338_v3 }
 0x217   :  { %v429_v6 = vpop.f32.mrf.mxu1 }
 0x218   :  { %v433_v7 = vadd.f32 %v429_v6, %v309_v4 }
 0x219   :  { %v1412_v8 = vpop.f32.mrf.mxu1 }
 0x21a   :  { %v1237_v9 = vmul.f32 -1.442695, %v433_v7 }
 0x21c   :  { %1499 = vpow2.f32 %v1237_v9 }
 0x229   :  { %v1500_v10 = vpop.eup %1499 }
 0x22a   :  { %v437_v11 = vadd.f32 1.0, %v1500_v10 }
 0x22c   :  { %1501 = vrcp.f32 %v437_v11 }
 0x239   :  { %v1502_v12 = vpop.eup %1501 }
 0x23a   :  { %v440_v13 = vmul.f32 2.0, %v1502_v12  ;;  %v442_v17 = vmul.f32 0.0, %v1502_v12 }
 0x23c   :  { %v1238_v14 = vadd.f32 -1.0, %v440_v13 }
 0x23e   :  { %444 = vrot.lane.b32.xlu0 %v1238_v14, %s1555_s4 }
 0x2b0   :  { %v445_v15 = vpop.permute.xlu0 %444 }
 0x2b1   :  { %v447_v16 = vmul.f32 %v1502_v12, %v445_v15 }
 0x2b3   :  { %449 = vrot.lane.b32.xlu1 %v447_v16, %s1556_s16 }
 0x325   :  { %v450_v18 = vpop.permute.xlu1 %449 }
 0x326   :  { %v452_v19 = vadd.f32 %v450_v18, %v442_v17 }
 0x328   :  { %1503 = vtanh.f32 %v452_v19 }
 0x335   :  { %v1504_v20 = vpop.eup %1503 }
 0x336   :  { %455 = vrot.lane.b32.xlu0 %v1504_v20, %s1555_s4 }
 0x3a8   :  { %v456_v21 = vpop.permute.xlu0 %455 }
 0x3a9   :  { %v458_v22 = vmul.f32 %v1502_v12, %v456_v21 }
 0x3ab   :  { %462 = vrot.lane.b32.xlu1 %v458_v22, %s1556_s16 }
 0x41d   :  { %v463_v23 = vpop.permute.xlu1 %462 }
 0x41e   :  { %1422 = vmatmul.mubr.msk.f32.vlgmr.msra.gmra.mxu1 %vm217_vm9, %v463_v23 }
 0x41f   :  { %1425 = vmatpush3.msra.mxu1 %v1687_v41  ;;  %1432 = vmatprep.mubr.msk.f32.mxu1 %vm1554_vm8, %v1553_v40 }
 0x420   :  { %1426 = vmatprep.subr.mxu1 %v1553_v40 }
 0x421   :  { %1427 = vmatpush3.msra.mxu1 %v1694_v42 }
 0x422   :  { %1428 = vmatprep.subr.mxu1 %v1553_v40 }
 0x423   :  { %1429 = vmatpush3.msra.mxu1 %v1701_v43 }
 0x424   :  { %1430 = vmatprep.subr.mxu1 %v1553_v40 }
 0x425   :  { %1431 = vmatpush3.msra.mxu1 %v1708_v44 }
 0x426   :  { %1446 = vmatprep.subr.mxu1 %v1553_v40 }
 0x4de   :  { %v532_v24 = vpop.f32.mrf.mxu1 }
 0x4df   :  { %v536_v25 = vadd.f32 %v532_v24, %v314_v55 }
 0x4e0   :  { %v1423_v26 = vpop.f32.mrf.mxu1 }
 0x4e1   :  { %v1240_v27 = vmul.f32 -1.442695, %v536_v25 }
 0x4e3   :  { %1505 = vpow2.f32 %v1240_v27 }
 0x4f0   :  { %v1506_v28 = vpop.eup %1505 }
 0x4f1   :  { %v540_v29 = vadd.f32 1.0, %v1506_v28 }
 0x4f3   :  { %1507 = vrcp.f32 %v540_v29 }
 0x500   :  { %v1508_v30 = vpop.eup %1507 }
 0x501   :  { %v543_v31 = vmul.f32 2.0, %v1508_v30  ;;  %v545_v35 = vmul.f32 %v1508_v30, %v452_v19 }
 0x503   :  { %v1241_v32 = vadd.f32 -1.0, %v543_v31 }
 0x505   :  { %547 = vrot.lane.b32.xlu0 %v1241_v32, %s1555_s4 }
 0x577   :  { %v548_v33 = vpop.permute.xlu0 %547 }
 0x578   :  { %v550_v34 = vmul.f32 %v1508_v30, %v548_v33 }
 0x57a   :  { %552 = vrot.lane.b32.xlu1 %v550_v34, %s1556_s16 }
 0x5ec   :  { %v553_v36 = vpop.permute.xlu1 %552 }
 0x5ed   :  { %v555_v37 = vadd.f32 %v553_v36, %v545_v35 }
 0x5ef   :  { %1509 = vtanh.f32 %v555_v37 }
 0x5fc   :  { %v1510_v38 = vpop.eup %1509 }
 0x5fd   :  { %558 = vrot.lane.b32.xlu0 %v1510_v38, %s1555_s4 }
 0x66f   :  { %v559_v39 = vpop.permute.xlu0 %558 }
 0x670   :  { %v561_v45 = vmul.f32 %v1508_v30, %v559_v39 }
 0x672   :  { %565 = vrot.lane.b32.xlu1 %v561_v45, %s1556_s16 }
 0x6e4   :  { %v566_v46 = vpop.permute.xlu1 %565 }
 0x6e5   :  { %1433 = vmatmul.mubr.msk.f32.vlgmr.msra.gmra.mxu1 %vm217_vm9, %v566_v46 }
 0x6e6   :  { %1447 = vmatpush3.msra.mxu1 %v1687_v41  ;;  %1454 = vmatprep.mubr.msk.f32.mxu1 %vm1554_vm8, %v1553_v40 }
 0x6e7   :  { %1448 = vmatprep.subr.mxu1 %v1553_v40 }
 0x6e8   :  { %1449 = vmatpush3.msra.mxu1 %v1694_v42 }
 0x6e9   :  { %1450 = vmatprep.subr.mxu1 %v1553_v40 }
 0x6ea   :  { %1451 = vmatpush3.msra.mxu1 %v1701_v43 }
 0x6eb   :  { %1452 = vmatprep.subr.mxu1 %v1553_v40 }
 0x6ec   :  { %1453 = vmatpush3.msra.mxu1 %v1708_v44 }
 0x6ed   :  { %1468 = vmatprep.subr.mxu1 %v1553_v40 }
 0x7a5   :  { %v635_v47 = vpop.f32.mrf.mxu1 }
 0x7a6   :  { %v639_v48 = vadd.f32 %v635_v47, %v1748_v60 }
 0x7a7   :  { %v1434_v49 = vpop.f32.mrf.mxu1 }
 0x7a8   :  { %v1243_v50 = vmul.f32 -1.442695, %v639_v48 }
 0x7aa   :  { %1511 = vpow2.f32 %v1243_v50 }
 0x7b7   :  { %v1512_v51 = vpop.eup %1511 }
 0x7b8   :  { %v643_v52 = vadd.f32 1.0, %v1512_v51 }
 0x7ba   :  { %1513 = vrcp.f32 %v643_v52 }
 0x7c7   :  { %v1514_v53 = vpop.eup %1513 }
 0x7c8   :  { %v646_v54 = vmul.f32 2.0, %v1514_v53  ;;  %v648_v59 = vmul.f32 %v1514_v53, %v555_v37 }
 0x7ca   :  { %v1244_v55 = vadd.f32 -1.0, %v646_v54 }
 0x7cc   :  { %650 = vrot.lane.b32.xlu0 %v1244_v55, %s1555_s4 }
 0x83e   :  { %v651_v56 = vpop.permute.xlu0 %650 }
 0x83f   :  { %v653_v57 = vmul.f32 %v1514_v53, %v651_v56 }
 0x841   :  { %655 = vrot.lane.b32.xlu1 %v653_v57, %s1556_s16 }
 0x8b3   :  { %v656_v61 = vpop.permute.xlu1 %655 }
 0x8b4   :  { %v658_v63 = vadd.f32 %v656_v61, %v648_v59 }
 0x8b6   :  { %1515 = vtanh.f32 %v658_v63 }
 0x8c3   :  { %v1516_v60 = vpop.eup %1515 }
 0x8c4   :  { %661 = vrot.lane.b32.xlu0 %v1516_v60, %s1555_s4 }
 0x936   :  { %v662_v1 = vpop.permute.xlu0 %661 }
 0x937   :  { %v664_v3 = vmul.f32 %v1514_v53, %v662_v1 }
 0x939   :  { %668 = vrot.lane.b32.xlu1 %v664_v3, %s1556_s16 }
 0x9ab   :  { %v669_v4 = vpop.permute.xlu1 %668 }
 0x9ac   :  { %1444 = vmatmul.mubr.msk.f32.vlgmr.msra.gmra.mxu0 %vm217_vm9, %v669_v4 }
 0x9ad   :  { %1458 = vmatpush3.msra.mxu0 %v1687_v41  ;;  %1465 = vmatprep.mubr.msk.f32.mxu0 %vm1554_vm8, %v1553_v40 }
 0x9ae   :  { %1459 = vmatprep.subr.mxu0 %v1553_v40 }
 0x9af   :  { %1460 = vmatpush3.msra.mxu0 %v1694_v42 }
 0x9b0   :  { %1461 = vmatprep.subr.mxu0 %v1553_v40 }
 0x9b1   :  { %1462 = vmatpush3.msra.mxu0 %v1701_v43 }
 0x9b2   :  { %1463 = vmatprep.subr.mxu0 %v1553_v40 }
 0x9b3   :  { %1464 = vmatpush3.msra.mxu0 %v1708_v44 }
 0x9b4   :  { %1479 = vmatprep.subr.mxu0 %v1553_v40 }
 0xa6c   :  { %v738_v6 = vpop.f32.mrf.mxu0 }
 0xa6d   :  { %v742_v7 = vadd.f32 %v738_v6, %v1746_v58 }
 0xa6e   :  { %v1445_v8 = vpop.f32.mrf.mxu0 }
 0xa6f   :  { %v1246_v9 = vmul.f32 -1.442695, %v742_v7 }
 0xa71   :  { %1517 = vpow2.f32 %v1246_v9 }
 0xa7e   :  { %v1518_v10 = vpop.eup %1517 }
 0xa7f   :  { %v746_v11 = vadd.f32 1.0, %v1518_v10 }
 0xa81   :  { %1519 = vrcp.f32 %v746_v11 }
 0xa8e   :  { %v1520_v12 = vpop.eup %1519 }
 0xa8f   :  { %v749_v13 = vmul.f32 2.0, %v1520_v12  ;;  %v751_v17 = vmul.f32 %v1520_v12, %v658_v63 }
 0xa91   :  { %v1247_v14 = vadd.f32 -1.0, %v749_v13 }
 0xa93   :  { %753 = vrot.lane.b32.xlu0 %v1247_v14, %s1555_s4 }
 0xb05   :  { %v754_v15 = vpop.permute.xlu0 %753 }
 0xb06   :  { %v756_v16 = vmul.f32 %v1520_v12, %v754_v15 }
 0xb08   :  { %758 = vrot.lane.b32.xlu1 %v756_v16, %s1556_s16 }
 0xb7a   :  { %v759_v18 = vpop.permute.xlu1 %758 }
 0xb7b   :  { %v761_v19 = vadd.f32 %v759_v18, %v751_v17 }
 0xb7d   :  { %1521 = vtanh.f32 %v761_v19 }
 0xb8a   :  { %v1522_v58 = vpop.eup %1521 }
 0xb8b   :  { %764 = vrot.lane.b32.xlu0 %v1522_v58, %s1555_s4 }
 0xbfd   :  { %v765_v20 = vpop.permute.xlu0 %764 }
 0xbfe   :  { %v767_v21 = vmul.f32 %v1520_v12, %v765_v20 }
 0xc00   :  { %771 = vrot.lane.b32.xlu1 %v767_v21, %s1556_s16 }
 0xc72   :  { %v772_v22 = vpop.permute.xlu1 %771 }
 0xc73   :  { %1455 = vmatmul.mubr.msk.f32.vlgmr.msra.gmra.mxu1 %vm217_vm9, %v772_v22 }
 0xc74   :  { %1469 = vmatpush3.msra.mxu1 %v1687_v41  ;;  %1476 = vmatprep.mubr.msk.f32.mxu1 %vm1554_vm8, %v1553_v40 }
 0xc75   :  { %1470 = vmatprep.subr.mxu1 %v1553_v40 }
 0xc76   :  { %1471 = vmatpush3.msra.mxu1 %v1694_v42 }
 0xc77   :  { %1472 = vmatprep.subr.mxu1 %v1553_v40 }
 0xc78   :  { %1473 = vmatpush3.msra.mxu1 %v1701_v43 }
 0xc79   :  { %1474 = vmatprep.subr.mxu1 %v1553_v40 }
 0xc7a   :  { %1475 = vmatpush3.msra.mxu1 %v1708_v44 }
 0xd33   :  { %v841_v23 = vpop.f32.mrf.mxu1 }
 0xd34   :  { %v845_v24 = vadd.f32 %v841_v23, %v1752_v0 }
 0xd35   :  { %v1456_v25 = vpop.f32.mrf.mxu1 }
 0xd36   :  { %v1249_v26 = vmul.f32 -1.442695, %v845_v24  ;;  %v1260_v25 = vld [vmem:[%s1866_s5] ss:$0 sm:$0xff] }
 0xd38   :  { %1523 = vpow2.f32 %v1249_v26 }
 0xd45   :  { %v1524_v27 = vpop.eup %1523 }
 0xd46   :  { %v849_v28 = vadd.f32 1.0, %v1524_v27 }
 0xd48   :  { %1525 = vrcp.f32 %v849_v28 }
 0xd55   :  { %v1526_v29 = vpop.eup %1525 }
 0xd56   :  { %v852_v30 = vmul.f32 2.0, %v1526_v29  ;;  %v854_v34 = vmul.f32 %v1526_v29, %v761_v19 }
 0xd58   :  { %v1250_v31 = vadd.f32 -1.0, %v852_v30 }
 0xd5a   :  { %856 = vrot.lane.b32.xlu0 %v1250_v31, %s1555_s4 }
 0xdcc   :  { %v857_v32 = vpop.permute.xlu0 %856 }
 0xdcd   :  { %v859_v33 = vmul.f32 %v1526_v29, %v857_v32 }
 0xdcf   :  { %861 = vrot.lane.b32.xlu1 %v859_v33, %s1556_s16 }
 0xe41   :  { %v862_v35 = vpop.permute.xlu1 %861 }
 0xe42   :  { %v864_v36 = vadd.f32 %v862_v35, %v854_v34  ;;  %v1198_v35 = vstv %s1867_s6 }
 0xe44   :  { %1527 = vtanh.f32 %v864_v36 }
 0xe51   :  { %v1528_v0 = vpop.eup %1527 }
 0xe52   :  { %867 = vrot.lane.b32.xlu0 %v1528_v0, %s1555_s4 }
 0xec4   :  { %v868_v37 = vpop.permute.xlu0 %867 }
 0xec5   :  { %v870_v38 = vmul.f32 %v1526_v29, %v868_v37 }
 0xec7   :  { %874 = vrot.lane.b32.xlu1 %v870_v38, %s1556_s16 }
 0xf39   :  { %v875_v39 = vpop.permute.xlu1 %874 }
 0xf3a   :  { %1466 = vmatmul.mubr.msk.f32.vlgmr.msra.gmra.mxu0 %vm217_vm9, %v875_v39 }
 0xf3b   :  { %1480 = vmatpush3.msra.mxu0 %v1687_v41  ;;  %1487 = vmatprep.mubr.msk.f32.mxu0 %vm1554_vm8, %v1553_v40 }
 0xf3c   :  { %1481 = vmatprep.subr.mxu0 %v1553_v40 }
 0xf3d   :  { %1482 = vmatpush3.msra.mxu0 %v1694_v42 }
 0xf3e   :  { %1483 = vmatprep.subr.mxu0 %v1553_v40 }
 0xf3f   :  { %1484 = vmatpush3.msra.mxu0 %v1701_v43 }
 0xf40   :  { %1485 = vmatprep.subr.mxu0 %v1553_v40 }
 0xf41   :  { %1486 = vmatpush3.msra.mxu0 %v1708_v44 }
 0xffa   :  { %v944_v45 = vpop.f32.mrf.mxu0 }
 0xffb   :  { %v948_v46 = vadd.f32 %v944_v45, %v1750_v62 }
 0xffc   :  { %v1467_v47 = vpop.f32.mrf.mxu0 }
 0xffd   :  { %v1252_v41 = vmul.f32 -1.442695, %v948_v46 }
 0xfff   :  { %1529 = vpow2.f32 %v1252_v41 }
0x100c   :  { %v1530_v48 = vpop.eup %1529 }
0x100d   :  { %v952_v49 = vadd.f32 1.0, %v1530_v48 }
0x100f   :  { %1531 = vrcp.f32 %v952_v49 }
0x101c   :  { %v1532_v50 = vpop.eup %1531 }
0x101d   :  { %v955_v51 = vmul.f32 2.0, %v1532_v50  ;;  %v957_v40 = vmul.f32 %v1532_v50, %v864_v36 }
0x101f   :  { %v1253_v42 = vadd.f32 -1.0, %v955_v51 }
0x1021   :  { %959 = vrot.lane.b32.xlu0 %v1253_v42, %s1555_s4 }
0x1093   :  { %v960_v52 = vpop.permute.xlu0 %959 }
0x1094   :  { %v962_v43 = vmul.f32 %v1532_v50, %v960_v52 }
0x1096   :  { %964 = vrot.lane.b32.xlu1 %v962_v43, %s1556_s16 }
0x1108   :  { %v965_v44 = vpop.permute.xlu1 %964 }
0x1109   :  { %v967_v53 = vadd.f32 %v965_v44, %v957_v40 }
0x110b   :  { %1533 = vtanh.f32 %v967_v53 }
0x1118   :  { %v1534_v62 = vpop.eup %1533 }
0x1119   :  { %970 = vrot.lane.b32.xlu0 %v1534_v62, %s1555_s4 }
0x118b   :  { %v971_v54 = vpop.permute.xlu0 %970 }
0x118c   :  { %v973_v55 = vmul.f32 %v1532_v50, %v971_v54 }
0x118e   :  { %977 = vrot.lane.b32.xlu1 %v973_v55, %s1556_s16 }
0x1200   :  { %v978_v56 = vpop.permute.xlu1 %977 }
0x1201   :  { %1477 = vmatmul.mubr.msk.f32.vlgmr.msra.gmra.mxu1 %vm217_vm9, %v978_v56 }
0x12c1   :  { %v1047_v57 = vpop.f32.mrf.mxu1 }
0x12c2   :  { %v1051_v59 = vadd.f32 %v1047_v57, %v1756_v5 }
0x12c3   :  { %v1478_v61 = vpop.f32.mrf.mxu1 }
0x12c4   :  { %v1255_v63 = vmul.f32 -1.442695, %v1051_v59 }
0x12c6   :  { %1535 = vpow2.f32 %v1255_v63 }
0x12d3   :  { %v1536_v60 = vpop.eup %1535 }
0x12d4   :  { %v1055_v1 = vadd.f32 1.0, %v1536_v60 }
0x12d6   :  { %1537 = vrcp.f32 %v1055_v1 }
0x12e3   :  { %v1538_v3 = vpop.eup %1537 }
0x12e4   :  { %v1058_v4 = vmul.f32 2.0, %v1538_v3  ;;  %v1060_v9 = vmul.f32 %v1538_v3, %v967_v53 }
0x12e6   :  { %v1256_v6 = vadd.f32 -1.0, %v1058_v4 }
0x12e8   :  { %1062 = vrot.lane.b32.xlu0 %v1256_v6, %s1555_s4 }
0x135a   :  { %v1063_v7 = vpop.permute.xlu0 %1062 }
0x135b   :  { %v1065_v8 = vmul.f32 %v1538_v3, %v1063_v7 }
0x135d   :  { %1067 = vrot.lane.b32.xlu1 %v1065_v8, %s1556_s16 }
0x13cf   :  { %v1068_v10 = vpop.permute.xlu1 %1067 }
0x13d0   :  { %v1070_v11 = vadd.f32 %v1068_v10, %v1060_v9 }
0x13d2   :  { %1539 = vtanh.f32 %v1070_v11 }
0x13df   :  { %v1540_v5 = vpop.eup %1539 }
0x13e0   :  { %1073 = vrot.lane.b32.xlu0 %v1540_v5, %s1555_s4 }
0x1452   :  { %v1074_v12 = vpop.permute.xlu0 %1073 }
0x1453   :  { %v1076_v13 = vmul.f32 %v1538_v3, %v1074_v12 }
0x1455   :  { %1080 = vrot.lane.b32.xlu1 %v1076_v13, %s1556_s16 }
0x14c7   :  { %v1081_v14 = vpop.permute.xlu1 %1080 }
0x14c8   :  { %1488 = vmatmul.mubr.msk.f32.vlgmr.msra.gmra.mxu0 %vm217_vm9, %v1081_v14 }
0x1588   :  { %v1150_v15 = vpop.f32.mrf.mxu0 }
0x1589   :  { %v1154_v16 = vadd.f32 %v1150_v15, %v1754_v2 }
0x158a   :  { %v1489_v17 = vpop.f32.mrf.mxu0 }
0x158b   :  { %v1258_v18 = vmul.f32 -1.442695, %v1154_v16 }
0x158d   :  { %1541 = vpow2.f32 %v1258_v18 }
0x159a   :  { %v1542_v19 = vpop.eup %1541 }
0x159b   :  { %v1158_v58 = vadd.f32 1.0, %v1542_v19 }
0x159d   :  { %1543 = vrcp.f32 %v1158_v58 }
0x15aa   :  { %v1544_v20 = vpop.eup %1543 }
0x15ab   :  { %v1161_v21 = vmul.f32 2.0, %v1544_v20  ;;  %v1163_v2 = vmul.f32 %v1544_v20, %v1070_v11 }
0x15ad   :  { %v1259_v22 = vadd.f32 -1.0, %v1161_v21 }
0x15af   :  { %1165 = vrot.lane.b32.xlu0 %v1259_v22, %s1555_s4 }
0x1621   :  { %v1166_v23 = vpop.permute.xlu0 %1165 }
0x1622   :  { %v1168_v24 = vmul.f32 %v1544_v20, %v1166_v23 }
0x1624   :  { %1170 = vrot.lane.b32.xlu1 %v1168_v24, %s1556_s16 }
0x1628   :  { %1186 = vrot.lane.b32.xlu1 %v1260_v25, %s1557_s19 }
0x1696   :  { %v1171_v26 = vpop.permute.xlu1 %1170 }
0x1697   :  { %v1173_v27 = vadd.f32 %v1171_v26, %v1163_v2 }
0x1699   :  { %1545 = vtanh.f32 %v1173_v27 }
0x169a   :  { %v1187_v30 = vpop.permute.xlu1 %1186 }
0x16a6   :  { %v1546_v28 = vpop.eup %1545 }
0x16a7   :  { %1176 = vrot.lane.b32.xlu0 %v1546_v28, %s1555_s4 }
0x1719   :  { %v1177_v29 = vpop.permute.xlu0 %1176 }
0x171a   :  { %v1179_v31 = vmul.f32 %v1544_v20, %v1177_v29 }
0x171c   :  { %v1189_v32 = vmul.f32 %v1187_v30, %v1179_v31 }
0x171e   :  { %1191 = vrot.lane.b32.xlu0 %v1189_v32, %s1556_s16 }
0x1790   :  { %v1192_v33 = vpop.permute.xlu0 %1191 }
0x1791   :  { %v1194_v34 = vsel %vm217_vm9, %v1192_v33, 0.0 }
0x1792   :  { %1195 = vadd.xlane.f32.xlu1 %v1194_v34 }
0x181b   :  { %v1196_v36 = vpop.xlane.xlu1 %1195 }
0x181c   :  { %v1199_v0 = vadd.f32 %v1198_v35, %v1196_v36 }
0x181e   :  { %v1261_v37 = vmul.f32 -1.442695, %v1199_v0 }
0x1820   :  { %1547 = vpow2.f32 %v1261_v37 }
0x182d   :  { %v1548_v38 = vpop.eup %1547 }
0x182e   :  { %v1203_v39 = vadd.f32 1.0, %v1548_v38 }
0x1830   :  { %1549 = vrcp.f32 %v1203_v39 }
0x183d   :  { %v1550_v45 = vpop.eup %1549 }
0x183e   :  { %1207 = vst.msk [vmem:[%s1868_s7] sm:$0xff] %vm1206_vm10, %v1550_v45 }

</bundles_post_ra>
